<compile_context>
chip_gen: v7x
topology: tpu7x:2x2x1
jax: 0.10.0
libtpu: 0.0.40
codegen_flags: <defaults>
</compile_context>

<pallas_src>
import functools

import jax
import jax.numpy as jnp
from jax.experimental import pallas as pl
from jax.experimental.pallas import tpu as pltpu


def _round_up(x, m):
    return ((x + m - 1) // m) * m


def _output_layer_kernel(x_ref, w1t_ref, b1_ref, w2_ref, b2_ref, o_ref, *, tb, l_p):
    # x_ref:   (tb*l_p, Din_p)      batch chunk, rows ordered (b, l)  [MXU dtype]
    # w1t_ref: (Din_p, Dout_p)      fc_1 weight, pre-transposed/padded
    # b1_ref:  (1, Dout_p)          f32
    # w2_ref:  (Lout_p, L_p)        fc_2 weight, padded (zero cols for padded l)
    # b2_ref:  (Lout_p, 1)          f32
    # o_ref:   (Lout_p, tb*Dout_p)  lane-dense output slab
    x = x_ref[...]

    # fc_1 + bias + ReLU: one big matmul, f32 accumulation, f32 elementwise.
    h = jnp.dot(x, w1t_ref[...], preferred_element_type=jnp.float32)
    h = jnp.maximum(h + b1_ref[...], 0.0)                  # (tb*l_p, Dout_p) f32
    h = h.astype(w2_ref.dtype)

    # Fold batch into the lane axis: (tb*l_p, Dout_p) -> (l_p, tb*Dout_p).
    # Slices are sublane-tile aligned (l_p is a multiple of the sublane tile).
    if tb == 1:
        hs = h
    else:
        hs = jnp.concatenate(
            [h[b * l_p:(b + 1) * l_p, :] for b in range(tb)], axis=1)

    # fc_2 mixes the (padded) length axis: (Lout_p, l_p) @ (l_p, tb*Dout_p).
    out = jnp.dot(w2_ref[...], hs, preferred_element_type=jnp.float32)
    out = out + b2_ref[...]                                # (Lout_p, 1) bias bcast
    o_ref[...] = out.astype(o_ref.dtype)


def prepare_output_layer_params(w1, b1, w2, b2, mxu_dtype=jnp.bfloat16):
    """Pad / transpose / cast fc_1 and fc_2 parameters once (hoist out of the
    per-call path).

    w1: (Dout, Din), b1: (Dout,)   -- fc_1, PyTorch nn.Linear layout
    w2: (Lout, L),   b2: (Lout,)   -- fc_2
    """
    Dout, Din = w1.shape
    Lout, L = w2.shape
    sub = 8 if jnp.dtype(mxu_dtype).itemsize >= 4 else 16   # sublane multiple
    Din_p, Dout_p = _round_up(Din, 128), _round_up(Dout, 128)
    L_p, Lout_p = _round_up(L, sub), _round_up(Lout, sub)

    w1t = jnp.pad(w1, ((0, Dout_p - Dout), (0, Din_p - Din))).T.astype(mxu_dtype)
    b1p = jnp.pad(b1, (0, Dout_p - Dout)).astype(jnp.float32).reshape(1, Dout_p)
    # Zero columns for padded l ensure padded-length rows of h (= relu(b1))
    # never contribute to the output.
    w2p = jnp.pad(w2, ((0, Lout_p - Lout), (0, L_p - L))).astype(mxu_dtype)
    b2p = jnp.pad(b2, (0, Lout_p - Lout)).astype(jnp.float32).reshape(Lout_p, 1)

    dims = dict(Din=Din, Dout=Dout, L=L, Lout=Lout,
                Din_p=Din_p, Dout_p=Dout_p, L_p=L_p, Lout_p=Lout_p,
                mxu_dtype=mxu_dtype)
    return (w1t, b1p, w2p, b2p), dims


def output_layer_apply(x, params, dims, *, block_b=None):
    """x: (B, L, Din) -> (B, Lout, Dout) using pre-prepared params."""
    w1t, b1p, w2p, b2p = params
    B, L, Din = x.shape
    assert L == dims["L"] and Din == dims["Din"]
    Din_p, Dout_p = dims["Din_p"], dims["Dout_p"]
    L_p, Lout_p = dims["L_p"], dims["Lout_p"]
    Lout, Dout = dims["Lout"], dims["Dout"]
    mxu_dtype = dims["mxu_dtype"]
    out_dtype = x.dtype

    # ---- batch tile: TB elements per grid step ------------------------------
    if block_b is None:
        tb = max(1, min(B, 256 // max(L_p, 1)))      # ~2 MXU M-passes of fc_1 rows
        in_bytes = jnp.dtype(mxu_dtype).itemsize
        out_bytes = jnp.dtype(out_dtype).itemsize

        def _blk_bytes(t):  # double-buffered in/out blocks + f32 intermediate
            return (2 * (t * L_p * Din_p * in_bytes
                         + Lout_p * t * Dout_p * out_bytes)
                    + t * L_p * Dout_p * 4)

        while tb > 1 and _blk_bytes(tb) > (8 << 20):
            tb = max(1, tb // 2)
    else:
        tb = max(1, min(block_b, B))
    B_p = _round_up(B, tb)
    grid_b = B_p // tb

    # ---- activations: pad, cast, flatten to a 2-D lane-dense layout ---------
    xp = jnp.pad(x, ((0, B_p - B), (0, L_p - L), (0, Din_p - Din)))
    x2 = xp.astype(mxu_dtype).reshape(B_p * L_p, Din_p)

    kernel = functools.partial(_output_layer_kernel, tb=tb, l_p=L_p)
    out2 = pl.pallas_call(
        kernel,
        out_shape=jax.ShapeDtypeStruct((Lout_p, B_p * Dout_p), out_dtype),
        grid_spec=pltpu.PrefetchScalarGridSpec(
            num_scalar_prefetch=0,
            grid=(grid_b,),
            in_specs=[
                pl.BlockSpec((tb * L_p, Din_p), lambda i: (i, 0)),   # x chunk
                pl.BlockSpec((Din_p, Dout_p), lambda i: (0, 0)),     # w1^T (resident)
                pl.BlockSpec((1, Dout_p), lambda i: (0, 0)),         # b1
                pl.BlockSpec((Lout_p, L_p), lambda i: (0, 0)),       # w2
                pl.BlockSpec((Lout_p, 1), lambda i: (0, 0)),         # b2
            ],
            out_specs=pl.BlockSpec((Lout_p, tb * Dout_p), lambda i: (0, i)),
        ),
        compiler_params=pltpu.CompilerParams(
            dimension_semantics=("parallel",)),
    )(x2, w1t, b1p, w2p, b2p)

    # (Lout_p, B_p*Dout_p) -> (B, Lout, Dout): cheap wrapper un-permute + unpad.
    out = out2.reshape(Lout_p, B_p, Dout_p).transpose(1, 0, 2)
    return out[:B, :Lout, :Dout]


def output_layer(x, w1, b1, w2, b2, *, mxu_dtype=jnp.bfloat16, block_b=None):
    """Drop-in convenience wrapper.  For repeated calls, hoist
    prepare_output_layer_params() and call output_layer_apply() directly."""
    params, dims = prepare_output_layer_params(w1, b1, w2, b2, mxu_dtype=mxu_dtype)
    return output_layer_apply(x, params, dims, block_b=block_b)


def _reference(x, w1, b1, w2, b2):
    h = jnp.maximum(jnp.einsum("bld,od->blo", x, w1) + b1, 0.0)  # (B, L, Dout)
    ht = jnp.swapaxes(h, 1, 2)                                   # (B, Dout, L)
    y = jnp.einsum("bdl,ol->bdo", ht, w2) + b2                   # (B, Dout, Lout)
    return jnp.swapaxes(y, 1, 2)                                 # (B, Lout, Dout)


if __name__ == "__main__":
    # Small shapes consistent with the module's forward.
    B = 2
    input_len, output_len = 8, 8
    input_dim, output_dim = 32, 32

    key = jax.random.PRNGKey(0)
    kx, kw1, kb1, kw2, kb2 = jax.random.split(key, 5)

    x = jax.random.normal(kx, (B, input_len, input_dim), dtype=jnp.float32)

    # Deterministic parameter init (PyTorch-Linear-like uniform bounds).
    bound1 = 1.0 / (input_dim ** 0.5)
    w1 = jax.random.uniform(kw1, (output_dim, input_dim), jnp.float32, -bound1, bound1)
    b1 = jax.random.uniform(kb1, (output_dim,), jnp.float32, -bound1, bound1)
    bound2 = 1.0 / (input_len ** 0.5)
    w2 = jax.random.uniform(kw2, (output_len, input_len), jnp.float32, -bound2, bound2)
    b2 = jax.random.uniform(kb2, (output_len,), jnp.float32, -bound2, bound2)

    ref = _reference(x, w1, b1, w2, b2)

    # 1) Exact-structure check: f32 MXU operands must match the f32 reference.
    params32, dims32 = prepare_output_layer_params(w1, b1, w2, b2,
                                                   mxu_dtype=jnp.float32)
    out_f32 = jax.block_until_ready(output_layer_apply(x, params32, dims32))
    assert out_f32.shape == (B, output_len, output_dim)
    assert jnp.allclose(out_f32, ref, atol=1e-5, rtol=1e-5)

    # 2) Default fast path: bf16 MXU operands, f32 accumulation / bias / ReLU.
    out_bf16 = jax.block_until_ready(output_layer(x, w1, b1, w2, b2))
    assert out_bf16.shape == (B, output_len, output_dim)
    assert jnp.allclose(out_bf16, ref, atol=5e-2, rtol=5e-2)

    print("KERNEL_OK")
</pallas_src>

<mosaic_0001>
module attributes {stable_mosaic.version = 11 : i64} {
  func.func @_output_layer_kernel(%arg0: i32, %arg1: memref<16x128xf32, #tpu.memory_space<vmem>>, %arg2: memref<128x128xf32, #tpu.memory_space<vmem>>, %arg3: memref<1x128xf32, #tpu.memory_space<vmem>>, %arg4: memref<8x8xf32, #tpu.memory_space<vmem>>, %arg5: memref<8x1xf32, #tpu.memory_space<vmem>>, %arg6: memref<8x256xf32, #tpu.memory_space<vmem>>) attributes {dimension_semantics = [#tpu.dimension_semantics<parallel>], iteration_bounds = array<i64: 1>, scalar_prefetch = 0 : i64, scratch_operands = 0 : i64, tpu.core_type = #tpu.core_type<tc>, window_params = [{transform_indices = @transform_0, window_bounds = array<i64: 16, 128>}, {pipeline_mode = #tpu.pipeline_mode<synchronous>, transform_indices = @transform_1, window_bounds = array<i64: 128, 128>}, {pipeline_mode = #tpu.pipeline_mode<synchronous>, transform_indices = @transform_2, window_bounds = array<i64: 1, 128>}, {pipeline_mode = #tpu.pipeline_mode<synchronous>, transform_indices = @transform_3, window_bounds = array<i64: 8, 8>}, {pipeline_mode = #tpu.pipeline_mode<synchronous>, transform_indices = @transform_4, window_bounds = array<i64: 8, 1>}, {transform_indices = @transform_5, window_bounds = array<i64: 8, 256>}]} {
    %c0 = arith.constant 0 : index
    %c0_0 = arith.constant 0 : index
    %0 = vector.load %arg1[%c0, %c0_0] : memref<16x128xf32, #tpu.memory_space<vmem>>, vector<16x128xf32>
    %c0_1 = arith.constant 0 : index
    %c0_2 = arith.constant 0 : index
    %1 = vector.load %arg2[%c0_1, %c0_2] : memref<128x128xf32, #tpu.memory_space<vmem>>, vector<128x128xf32>
    %cst = arith.constant dense<0.000000e+00> : vector<16x128xf32>
    %2 = tpu.matmul %0, %1, %cst {dimension_numbers = #tpu.dot_dimension_numbers<[1], [0], [0], [1], [0, 0, 1, 1], [], []>} : vector<16x128xf32>, vector<128x128xf32>, vector<16x128xf32> -> vector<16x128xf32>
    %c0_3 = arith.constant 0 : index
    %c0_4 = arith.constant 0 : index
    %3 = vector.load %arg3[%c0_3, %c0_4] : memref<1x128xf32, #tpu.memory_space<vmem>>, vector<1x128xf32>
    %4 = vector.broadcast %3 : vector<1x128xf32> to vector<16x128xf32>
    %5 = arith.addf %2, %4 : vector<16x128xf32>
    %cst_5 = arith.constant 0.000000e+00 : f32
    %6 = vector.broadcast %cst_5 : f32 to vector<16x128xf32>
    %7 = arith.maximumf %5, %6 : vector<16x128xf32>
    %8 = vector.extract_strided_slice %7 {offsets = [0, 0], sizes = [8, 128], strides = [1, 1]} : vector<16x128xf32> to vector<8x128xf32>
    %9 = vector.extract_strided_slice %7 {offsets = [8, 0], sizes = [8, 128], strides = [1, 1]} : vector<16x128xf32> to vector<8x128xf32>
    %10 = tpu.concatenate %8, %9 in 1 : vector<8x128xf32>, vector<8x128xf32> -> vector<8x256xf32>
    %c0_6 = arith.constant 0 : index
    %c0_7 = arith.constant 0 : index
    %11 = vector.load %arg4[%c0_6, %c0_7] : memref<8x8xf32, #tpu.memory_space<vmem>>, vector<8x8xf32>
    %cst_8 = arith.constant dense<0.000000e+00> : vector<8x256xf32>
    %12 = tpu.matmul %11, %10, %cst_8 {dimension_numbers = #tpu.dot_dimension_numbers<[1], [0], [0], [1], [0, 0, 1, 1], [], []>} : vector<8x8xf32>, vector<8x256xf32>, vector<8x256xf32> -> vector<8x256xf32>
    %c0_9 = arith.constant 0 : index
    %c0_10 = arith.constant 0 : index
    %13 = vector.load %arg5[%c0_9, %c0_10] : memref<8x1xf32, #tpu.memory_space<vmem>>, vector<8x1xf32>
    %14 = vector.broadcast %13 : vector<8x1xf32> to vector<8x256xf32>
    %15 = arith.addf %12, %14 : vector<8x256xf32>
    %c0_11 = arith.constant 0 : index
    %c0_12 = arith.constant 0 : index
    %16 = vector.load %arg6[%c0_11, %c0_12] : memref<8x256xf32, #tpu.memory_space<vmem>>, vector<8x256xf32>
    tpu.vector_store %arg6[%c0_11, %c0_12], %15 {strides = array<i32>} : memref<8x256xf32, #tpu.memory_space<vmem>>, vector<8x256xf32>,
    return
  }
  func.func @transform_0(%arg0: i32) -> (i32, i32) {
    %c0_i32 = arith.constant 0 : i32
    %c0_i32_0 = arith.constant 0 : i32
    return %arg0, %c0_i32 : i32, i32
  }
  func.func @transform_1(%arg0: i32) -> (i32, i32) {
    %c0_i32 = arith.constant 0 : i32
    %c0_i32_0 = arith.constant 0 : i32
    %c0_i32_1 = arith.constant 0 : i32
    return %c0_i32, %c0_i32_0 : i32, i32
  }
  func.func @transform_2(%arg0: i32) -> (i32, i32) {
    %c0_i32 = arith.constant 0 : i32
    %c0_i32_0 = arith.constant 0 : i32
    %c0_i32_1 = arith.constant 0 : i32
    return %c0_i32, %c0_i32_0 : i32, i32
  }
  func.func @transform_3(%arg0: i32) -> (i32, i32) {
    %c0_i32 = arith.constant 0 : i32
    %c0_i32_0 = arith.constant 0 : i32
    %c0_i32_1 = arith.constant 0 : i32
    return %c0_i32, %c0_i32_0 : i32, i32
  }
  func.func @transform_4(%arg0: i32) -> (i32, i32) {
    %c0_i32 = arith.constant 0 : i32
    %c0_i32_0 = arith.constant 0 : i32
    %c0_i32_1 = arith.constant 0 : i32
    return %c0_i32, %c0_i32_0 : i32, i32
  }
  func.func @transform_5(%arg0: i32) -> (i32, i32) {
    %c0_i32 = arith.constant 0 : i32
    %c0_i32_0 = arith.constant 0 : i32
    return %c0_i32, %arg0 : i32, i32
  }
}

</mosaic_0001>

<bundles_post_ra>
// kernel: tpu_custom_call.1
= control target key start
LH: loop header
LB: loop body
LE: loop exit
PB: predicated region body
PF: predicated region fallthrough
CT: control target
= control target key end

     0   :  { %10 = vsyncpa [#allocation3], 0  ;;  %s500_s0 = inlined_call_operand.hbm [shape: f32[16,128], index: 0, kind: input, shape index: {}]   ;;  %s501_s1 = inlined_call_operand.hbm [shape: f32[128,128], index: 1, kind: input, shape index: {}]   ;;  %s502_s2 = inlined_call_operand.vmem [shape: f32[1,128], index: 2, kind: input, shape index: {}]   ;;  %s503_s3 = inlined_call_operand.vmem [shape: f32[8,8], index: 3, kind: input, shape index: {}]   ;;  %s504_s4 = inlined_call_operand.vmem [shape: f32[8,1], index: 4, kind: input, shape index: {}]   ;;  %s505_s5 = inlined_call_operand.hbm [shape: f32[8,256], index: 5, kind: output, shape index: {}]  }
   0x1   :  { %11 = vsyncpa [#allocation6], 0 }
   0x2   :  { %12 = vsyncpa [#allocation4], 0  ;;  %s418_s18 = smov [#allocation2]   ;;  %s346_s22 = scalar_lea.hbm %s500_s0, 256 }
   0x3   :  { %s18_s19 = sshll.u32 %s418_s18, 4  ;;  %p347_p0 = scmp.ne.s32.totalorder %s500_s0, %s346_s22  ;;  %s19_s19 = int_to_ptr.vmem [resolvable:$true] %s18_s19 }
   0x4   :  { %p350_p1 = scmp.lt.u32.totalorder %s346_s22, %s500_s0 }
   0x6   :  { %p352_p2 = pnand %p350_p1, %p347_p0 }
   0x8   :  { %355 = shalt.err (!%p352_p2)
}
   0x9   :  { %s356_s27 = scalar_lea.vmem %s19_s19, 256  ;;  %p361_p4 = scmp.lt.s32.totalorder %s19_s19, %s19_s19 }
   0xa   :  { %p357_p3 = scmp.ne.s32.totalorder %s19_s19, %s356_s27  ;;  %p362_p5 = scmp.lt.s32.totalorder %s356_s27, %s356_s27 }
   0xc   :  { %p363_p6 = por %p362_p5, %p361_p4 }
   0xe   :  { %p364_p7 = pnand %p363_p6, %p357_p3 }
  0x10   :  { %367 = shalt.err (!%p364_p7)
}
  0x11   :  { %s419_s28 = smov 128   ;;  %s420_s29 = smov 8  }
  0x12   :  { %24 = dma.hbm_to_vmem [thread:$0]  %s500_s0, 256, %s19_s19, [#allocation3], %s419_s28, %s419_s28, %s420_s29  }
  0x13   :  { %s421_s7 = smov [#allocation5]   ;;  %s368_s11 = scalar_lea.hbm %s501_s1, 2048 }
  0x14   :  { %s30_s8 = sshll.u32 %s421_s7, 4  ;;  %p369_p8 = scmp.ne.s32.totalorder %s501_s1, %s368_s11  ;;  %s31_s8 = int_to_ptr.vmem [resolvable:$true] %s30_s8 }
  0x15   :  { %p372_p9 = scmp.lt.u32.totalorder %s368_s11, %s501_s1 }
  0x17   :  { %p374_p10 = pnand %p372_p9, %p369_p8 }
  0x19   :  { %377 = shalt.err (!%p374_p10)
}
  0x1a   :  { %s378_s16 = scalar_lea.vmem %s31_s8, 2048  ;;  %p383_p12 = scmp.lt.s32.totalorder %s31_s8, %s31_s8 }
  0x1b   :  { %p379_p11 = scmp.ne.s32.totalorder %s31_s8, %s378_s16  ;;  %p384_p13 = scmp.lt.s32.totalorder %s378_s16, %s378_s16 }
  0x1d   :  { %p385_p0 = por %p384_p13, %p383_p12 }
  0x1f   :  { %p386_p1 = pnand %p385_p0, %p379_p11 }
  0x21   :  { %389 = shalt.err (!%p386_p1)
}
  0x22   :  { %36 = dma.hbm_to_vmem [thread:$0]  %s501_s1, 2048, %s31_s8, [#allocation6], %s419_s28, %s419_s28, %s420_s29  }
  0x23   :  { %412 = dma.done.wait [#allocation3], 256  }
  0x24   :  { %413 = vsyncadd [#allocation3], 4294967040 }
  0x25   :  { %414 = dma.done.wait [#allocation6], 2048  }
  0x26   :  { %415 = vsyncadd [#allocation6], 4294965248  ;;  %v51_v0 = vld [vmem:[#allocation5] sm:$0xff]  ;;  %v52_v1 = vld [vmem:[#allocation5 + $0x8] sm:$0xff]  ;;  %v422_v26 = vmov 0.0   ;;  %v423_v28 = vmov 0  }
  0x27   :  { %v53_v2 = vld [vmem:[#allocation5 + $0x10] sm:$0xff]  ;;  %v306_v3 = vpack.c.bf16 %v52_v1, %v51_v0  ;;  %v54_v4 = vld [vmem:[#allocation5 + $0x18] sm:$0xff]  ;;  %v55_v6 = vld [vmem:[#allocation5 + $0x20] sm:$0xff]  ;;  %226 = vmatprep.mubr.f32.mxu1 %v422_v26  ;;  %345 = vset.pattern.permute.xlu0 %v423_v28  ;;  %vm158_vm0 = vcmask 64512  }
  0x28   :  { %v310_v5 = vpack.c.bf16 %v54_v4, %v53_v2  ;;  %v56_v7 = vld [vmem:[#allocation5 + $0x28] sm:$0xff]  ;;  %v49_v9 = vld [vmem:[#allocation2] sm:$0xff]  ;;  %v58_v11 = vld [vmem:[#allocation5 + $0x38] sm:$0xff] }
  0x29   :  { %307 = vmatprep.subr.bf16.mxu0 %v306_v3  ;;  %v314_v8 = vpack.c.bf16 %v56_v7, %v55_v6  ;;  %v57_v10 = vld [vmem:[#allocation5 + $0x30] sm:$0xff]  ;;  %303 = vmatprep.mubr.f32.mxu0 %v49_v9  ;;  %v59_v13 = vld [vmem:[#allocation5 + $0x40] sm:$0xff]  ;;  %v60_v14 = vld [vmem:[#allocation5 + $0x48] sm:$0xff] }
  0x2a   :  { %309 = vmatpush3.bf16.msra.mxu0 %v306_v3  ;;  %v318_v12 = vpack.c.bf16 %v58_v11, %v57_v10  ;;  %v322_v15 = vpack.c.bf16 %v60_v14, %v59_v13  ;;  %v61_v16 = vld [vmem:[#allocation5 + $0x50] sm:$0xff]  ;;  %v62_v17 = vld [vmem:[#allocation5 + $0x58] sm:$0xff]  ;;  %v63_v19 = vld [vmem:[#allocation5 + $0x60] sm:$0xff] }
  0x2b   :  { %311 = vmatprep.subr.bf16.mxu0 %v310_v5  ;;  %v326_v18 = vpack.c.bf16 %v62_v17, %v61_v16  ;;  %v64_v20 = vld [vmem:[#allocation5 + $0x68] sm:$0xff]  ;;  %v65_v22 = vld [vmem:[#allocation5 + $0x70] sm:$0xff]  ;;  %v66_v23 = vld [vmem:[#allocation5 + $0x78] sm:$0xff] }
  0x2c   :  { %v330_v21 = vpack.c.bf16 %v64_v20, %v63_v19  ;;  %v334_v24 = vpack.c.bf16 %v66_v23, %v65_v22  ;;  %v50_v25 = vld [vmem:[#allocation2 + $0x8] sm:$0xff]  ;;  %v152_v27 = vld [vmem:[%s504_s4] sm:$0xff]  ;;  %s424_s4 = smov [#allocation7]  }
  0x2d   :  { %155 = vperm.xlu0 %345, %v152_v27   ;;  %v251_v29 = vld [vmem:[%s502_s2] ss:$0 sm:$0xff]  ;;  %s241_s23 = sshll.u32 %s424_s4, 4  ;;  %s242_s23 = int_to_ptr.vmem [resolvable:$true] %s241_s23 }
  0x2e   :  { %313 = vmatpush3.bf16.msra.mxu0 %v310_v5  ;;  %v151_v36 = vld [vmem:[%s503_s3] sm:$0xff]  ;;  %s390_s2 = scalar_lea.vmem %s242_s23, 256  ;;  %p395_p3 = scmp.lt.s32.totalorder %s242_s23, %s242_s23 }
  0x2f   :  { %315 = vmatprep.subr.bf16.mxu0 %v314_v8  ;;  %p391_p2 = scmp.ne.s32.totalorder %s242_s23, %s390_s2  ;;  %p396_p4 = scmp.lt.s32.totalorder %s390_s2, %s390_s2 }
  0x31   :  { %p397_p5 = por %p396_p4, %p395_p3 }
  0x32   :  { %317 = vmatpush3.bf16.msra.mxu0 %v314_v8 }
  0x33   :  { %319 = vmatprep.subr.bf16.mxu0 %v318_v12  ;;  %p398_p6 = pnand %p397_p5, %p391_p2 }
  0x36   :  { %321 = vmatpush3.bf16.msra.mxu0 %v318_v12 }
  0x37   :  { %323 = vmatprep.subr.bf16.mxu0 %v322_v15 }
  0x3a   :  { %325 = vmatpush3.bf16.msra.mxu0 %v322_v15 }
  0x3b   :  { %327 = vmatprep.subr.bf16.mxu0 %v326_v18 }
  0x3e   :  { %329 = vmatpush3.bf16.msra.mxu0 %v326_v18 }
  0x3f   :  { %331 = vmatprep.subr.bf16.mxu0 %v330_v21 }
  0x42   :  { %333 = vmatpush3.bf16.msra.mxu0 %v330_v21 }
  0x43   :  { %335 = vmatprep.subr.bf16.mxu0 %v334_v24 }
  0x46   :  { %337 = vmatpush3.bf16.msra.mxu0 %v334_v24 }
  0x49   :  { %304 = vmatmul.mubr.f32.vlgmr.msra.gmra.mrb[0].mxu0 %v50_v25 }
  0xac   :  { %v156_v37 = vpop.permute.xlu0 %155 }
 0x11c   :  { %v305_v30 = vpop.f32.mrb[0].mxu0 }
 0x11d   :  { %v140_v31 = vpop.f32.mrb[1].mxu0  ;;  %v146_v32 = vadd.f32 %v305_v30, %v251_v29 }
 0x11e   :  { %v141_v33 = vadd.f32 %v251_v29, %v140_v31 }
 0x11f   :  { %v150_v34 = vmax.f32 %v146_v32, 0.0 }
 0x120   :  { %v149_v35 = vmax.f32 %v141_v33, 0.0 }
 0x121   :  { %162 = vmatprep.subr.mxu1 %v150_v34 }
 0x122   :  { %163 = vmatpush1.msra.mxu1 %v149_v35 }
 0x123   :  { %252 = vmatmul.mubr.msk.f32.vlgmr.msra.gmra.mrb[0].mxu1 %vm158_vm0, %v151_v36 }
 0x1f6   :  { %v228_v38 = vpop.f32.mrb[0].mxu1 }
 0x1f7   :  { %v229_v39 = vadd.f32 %v228_v38, %v156_v37  ;;  %v230_v40 = vpop.f32.mrb[1].mxu1 }
 0x1f8   :  { %v231_v41 = vadd.f32 %v230_v40, %v156_v37 }
 0x1f9   :  { %233 = vst [vmem:[#allocation7] sm:$0xff] %v229_v39 }
 0x1fa   :  { %234 = vst [vmem:[#allocation7 + $0x8] sm:$0xff] %v231_v41 }
 0x1fb   :  { %401 = shalt.err (!%p398_p6)
}
 0x1fc   :  { %s402_s25 = scalar_lea.hbm %s505_s5, 256 }
 0x1fd   :  { %p403_p7 = scmp.ne.s32.totalorder %s505_s5, %s402_s25  ;;  %p406_p8 = scmp.lt.u32.totalorder %s402_s25, %s505_s5 }
 0x1ff   :  { %p408_p9 = pnand %p406_p8, %p403_p7 }
 0x201   :  { %411 = shalt.err (!%p408_p9)
}
 0x202   :  { %244 = dma.vmem_to_hbm [thread:$0]  %s242_s23, 256, %s505_s5, [#allocation4]  }
 0x203   :  { %416 = dma.done.wait [#allocation4], 256  }
 0x204   :  { %417 = vsyncadd [#allocation4], 4294967040 }
 0x205   :  { %248 = vsyncpa [#allocation3], 1 }
 0x206   :  { %249 = vsyncpa [#allocation6], 1 }
 0x207   :  { %250 = vsyncpa [#allocation4], 1 }

</bundles_post_ra>
